<compile_context>
chip_gen: v7x
topology: tpu7x:2x2x1
jax: 0.10.0
libtpu: 0.0.40
codegen_flags: <defaults>
</compile_context>

<pallas_src>
import functools

import jax
import jax.numpy as jnp
import numpy as np
from jax import lax
from jax.experimental import pallas as pl
from jax.experimental.pallas import tpu as pltpu

LN_EPS = 1e-5


def _round_up(a, m):
    return ((a + m - 1) // m) * m


def _vmem_capacity_bytes():
    try:
        return int(pltpu.get_tpu_info().vmem_capacity_bytes)
    except Exception:
        return 64 * 1024 * 1024  # conservative (v7x per-TC VMEM)


def _ln_relu_store(y, p_ref, o_ref, *, cout_real, needs_mask):
    """LayerNorm (over real cout) + affine + ReLU, store into o_ref."""
    p = p_ref[...]
    bias = p[0:1, :]
    gamma = p[1:2, :]
    beta = p[2:3, :]
    y = y + bias
    inv_c = jnp.float32(1.0 / cout_real)
    if needs_mask:
        lane = lax.broadcasted_iota(jnp.int32, (1, y.shape[-1]), 1)
        valid = lane < cout_real  # mask lane padding out of the LN statistics
        mean = jnp.sum(jnp.where(valid, y, 0.0), axis=-1, keepdims=True) * inv_c
        centered = jnp.where(valid, y - mean, 0.0)
    else:
        mean = jnp.sum(y, axis=-1, keepdims=True) * inv_c
        centered = y - mean
    var = jnp.sum(centered * centered, axis=-1, keepdims=True) * inv_c
    out = centered * lax.rsqrt(var + LN_EPS) * gamma + beta
    # Padded lanes (if any) have gamma = beta = 0 -> output 0; sliced off later.
    o_ref[...] = jnp.maximum(out, 0.0).astype(o_ref.dtype)


def _kernel_single_k(x_ref, w_ref, p_ref, o_ref, *, cout_real, needs_mask, mxu_dtype):
    # x_ref: (tm, cin), w_ref: (cin, cout_p), p_ref: (3, cout_p) f32,
    # o_ref: (tm, cout_p) f32 (lane-dense).
    x = x_ref[...]
    w = w_ref[...]
    if mxu_dtype is not None:
        x = x.astype(mxu_dtype)  # in-register cast: bf16 MXU path, no extra HBM pass
        w = w.astype(mxu_dtype)
    y = jnp.dot(x, w, preferred_element_type=jnp.float32)
    _ln_relu_store(y, p_ref, o_ref, cout_real=cout_real, needs_mask=needs_mask)


def _kernel_multi_k(x_ref, w_ref, p_ref, o_ref, *, cout_real, needs_mask, mxu_dtype):
    # K-accumulation variant: grid = (row_tiles, nk); o_ref (f32) is the
    # accumulator (output block index is constant along k).
    k = pl.program_id(1)
    nk = pl.num_programs(1)
    x = x_ref[...]
    w = w_ref[...]
    if mxu_dtype is not None:
        x = x.astype(mxu_dtype)
        w = w.astype(mxu_dtype)
    partial = jnp.dot(x, w, preferred_element_type=jnp.float32)

    @pl.when(k == 0)
    def _():
        o_ref[...] = partial

    @pl.when(k > 0)
    def _():
        o_ref[...] = o_ref[...] + partial

    @pl.when(k == nk - 1)
    def _():
        _ln_relu_store(o_ref[...], p_ref, o_ref,
                       cout_real=cout_real, needs_mask=needs_mask)


def basic_forward(x, w, b, gamma, beta, *, tm_target=512, compute_dtype=None,
                  max_tk=None):
    """Fused Linear + LayerNorm + ReLU.

    x: (..., cin); w: (cout, cin); b, gamma, beta: (cout,).
    compute_dtype: if set (e.g. jnp.bfloat16), the matmul inputs are cast to it
    *inside* the kernel (f32 accumulation / LayerNorm either way).
    Returns (..., cout) float32.
    """
    x = jnp.asarray(x)
    w = jnp.asarray(w)
    orig_lead = x.shape[:-1]
    cin = x.shape[-1]
    cout = w.shape[0]
    x2 = x.reshape(-1, cin)
    N = x2.shape[0]

    cout_p = _round_up(cout, 128)  # lane-dense output slab
    pad_c = cout_p - cout
    needs_mask = pad_c != 0
    mxu_dtype = compute_dtype

    # ---- generation-aware VMEM budget --------------------------------------
    vmem_cap = _vmem_capacity_bytes()
    if vmem_cap >= 100 * 1024 * 1024:       # v5e / v6e: 128 MiB physical VMEM
        budget = 96 * 1024 * 1024
        vmem_limit = 112 * 1024 * 1024
    else:                                    # v7x: 64 MiB per TensorCore
        budget = 40 * 1024 * 1024
        vmem_limit = 48 * 1024 * 1024

    x_bytes = x2.dtype.itemsize
    w_bytes = w.dtype.itemsize

    # ---- K (cin) tiling: only when the resident weight would not fit --------
    if max_tk is not None:
        tk = min(cin, int(max_tk))
    else:
        full_w = cin * cout_p * w_bytes      # single-buffered resident weight
        if full_w <= budget // 3 or cin % 128 != 0:
            tk = cin
        else:
            tk = (budget // 3) // (2 * cout_p * w_bytes)
            tk = max(128, (tk // 128) * 128)
            tk = min(tk, cin)
            while cin % tk != 0:             # tk must evenly tile cin
                tk -= 128
    nk = cin // tk if tk < cin else 1
    if nk > 1:
        assert cin % tk == 0 and tk % 128 == 0, "cin tile must be a 128-multiple divisor"

    # ---- VMEM accounting (real buffer counts & dtype sizes) -----------------
    p_buf = 8 * cout_p * 4                                  # (3,cout_p) pads to (8,cout_p), 1 buffer
    if nk == 1:
        w_buf = cin * cout_p * w_bytes                      # Buffered(1) resident weight
    else:
        w_buf = 2 * tk * cout_p * w_bytes                   # streamed, double-buffered
    per_row = 2 * tk * x_bytes + 2 * cout_p * 4             # x tile + out tile, double-buffered
    avail = max(0, budget - w_buf - p_buf)
    tm_cap = max(8, avail // per_row)

    # ---- row tile ------------------------------------------------------------
    tm = min(tm_target, tm_cap, _round_up(N, 8))
    if N > 256:
        # keep >= 2 row tiles so ("parallel",) can shard across v7x's 2 TCs
        tm = min(tm, _round_up(pl.cdiv(N, 2), 8))
    if tm >= 256:
        tm = (tm // 256) * 256      # MXU-cadence-aligned M (v6e/v7x 2x256^2)
    else:
        tm = max(8, (tm // 8) * 8)
    n_row_tiles = pl.cdiv(N, tm)    # ragged last block clipped by Pallas

    # ---- layout plumbing (lane padding only; no row padding, no x cast) -----
    w_t = w.T                                               # (cin, cout)
    if pad_c:
        w_t = jnp.pad(w_t, ((0, 0), (0, pad_c)))
    params = jnp.stack([
        jnp.pad(jnp.asarray(b, jnp.float32), (0, pad_c)),
        jnp.pad(jnp.asarray(gamma, jnp.float32), (0, pad_c)),
        jnp.pad(jnp.asarray(beta, jnp.float32), (0, pad_c)),
    ])                                                      # (3, cout_p) f32

    if nk == 1:
        kernel = functools.partial(_kernel_single_k, cout_real=cout,
                                   needs_mask=needs_mask, mxu_dtype=mxu_dtype)
        grid = (n_row_tiles,)
        in_specs = [
            pl.BlockSpec((tm, cin), lambda i: (i, 0)),                    # x row tile
            pl.BlockSpec((cin, cout_p), lambda i: (0, 0),
                         pipeline_mode=pl.Buffered(1)),                   # resident weight
            pl.BlockSpec((3, cout_p), lambda i: (0, 0),
                         pipeline_mode=pl.Buffered(1)),                   # fused b/gamma/beta
        ]
        out_specs = pl.BlockSpec((tm, cout_p), lambda i: (i, 0))
        dim_sem = ("parallel",)
    else:
        kernel = functools.partial(_kernel_multi_k, cout_real=cout,
                                   needs_mask=needs_mask, mxu_dtype=mxu_dtype)
        grid = (n_row_tiles, nk)
        in_specs = [
            pl.BlockSpec((tm, tk), lambda i, k: (i, k)),                  # x tile
            pl.BlockSpec((tk, cout_p), lambda i, k: (k, 0)),              # weight K-slab
            pl.BlockSpec((3, cout_p), lambda i, k: (0, 0),
                         pipeline_mode=pl.Buffered(1)),                   # fused b/gamma/beta
        ]
        out_specs = pl.BlockSpec((tm, cout_p), lambda i, k: (i, 0))       # accumulator
        dim_sem = ("parallel", "arbitrary")

    out = pl.pallas_call(
        kernel,
        out_shape=jax.ShapeDtypeStruct((N, cout_p), jnp.float32),
        grid_spec=pltpu.PrefetchScalarGridSpec(
            num_scalar_prefetch=0,
            grid=grid,
            in_specs=in_specs,
            out_specs=out_specs,
        ),
        compiler_params=pltpu.CompilerParams(
            dimension_semantics=dim_sem,
            vmem_limit_bytes=vmem_limit,
        ),
    )(x2, w_t, params)

    if pad_c:
        out = out[:, :cout]
    return out.reshape(*orig_lead, cout)


def basic_reference(x, w, b, gamma, beta):
    y = x @ w.T + b
    mean = jnp.mean(y, axis=-1, keepdims=True)
    var = jnp.mean((y - mean) ** 2, axis=-1, keepdims=True)
    y = (y - mean) / jnp.sqrt(var + LN_EPS)
    y = y * gamma + beta
    return jnp.maximum(y, 0.0)


if __name__ == "__main__":
    key = jax.random.PRNGKey(0)
    ks = jax.random.split(key, 15)

    # --- 1) small shape consistent with the module: batch=16, cin=32, cout=64
    N, cin, cout = 16, 32, 64
    x = jax.random.normal(ks[0], (N, cin), dtype=jnp.float32)
    bound = 1.0 / np.sqrt(cin)
    w = jax.random.uniform(ks[1], (cout, cin), jnp.float32, -bound, bound)
    b = jax.random.uniform(ks[2], (cout,), jnp.float32, -bound, bound)
    gamma = 1.0 + 0.1 * jax.random.normal(ks[3], (cout,), jnp.float32)
    beta = 0.1 * jax.random.normal(ks[4], (cout,), jnp.float32)

    ref = basic_reference(x, w, b, gamma, beta)
    out = jax.block_until_ready(basic_forward(x, w, b, gamma, beta))
    np.testing.assert_allclose(np.asarray(out), np.asarray(ref), rtol=1e-5, atol=1e-5)

    # bf16 MXU-input fast path (in-kernel cast); LN stays f32 -> loose tolerance.
    out_bf16 = jax.block_until_ready(
        basic_forward(x, w, b, gamma, beta, compute_dtype=jnp.bfloat16))
    np.testing.assert_allclose(np.asarray(out_bf16), np.asarray(ref),
                               rtol=5e-2, atol=5e-2)

    # --- 2) multi-row-tile grid + ragged rows + lane padding (no row padding)
    N2, cin2, cout2 = 1000, 128, 192   # N % tm != 0, cout % 128 != 0
    x2 = jax.random.normal(ks[5], (N2, cin2), dtype=jnp.float32)
    bound2 = 1.0 / np.sqrt(cin2)
    w2 = jax.random.uniform(ks[6], (cout2, cin2), jnp.float32, -bound2, bound2)
    b2 = jax.random.uniform(ks[7], (cout2,), jnp.float32, -bound2, bound2)
    gamma2 = 1.0 + 0.1 * jax.random.normal(ks[8], (cout2,), jnp.float32)
    beta2 = 0.1 * jax.random.normal(ks[9], (cout2,), jnp.float32)

    out2 = jax.block_until_ready(basic_forward(x2, w2, b2, gamma2, beta2))
    ref2 = basic_reference(x2, w2, b2, gamma2, beta2)
    np.testing.assert_allclose(np.asarray(out2), np.asarray(ref2), rtol=1e-3, atol=1e-3)

    # --- 3) force the K-accumulation path (cin tiled into 128-wide slabs)
    N3, cin3, cout3 = 300, 256, 192
    x3 = jax.random.normal(ks[10], (N3, cin3), dtype=jnp.float32)
    bound3 = 1.0 / np.sqrt(cin3)
    w3 = jax.random.uniform(ks[11], (cout3, cin3), jnp.float32, -bound3, bound3)
    b3 = jax.random.uniform(ks[12], (cout3,), jnp.float32, -bound3, bound3)
    gamma3 = 1.0 + 0.1 * jax.random.normal(ks[13], (cout3,), jnp.float32)
    beta3 = 0.1 * jax.random.normal(ks[14], (cout3,), jnp.float32)

    out3 = jax.block_until_ready(
        basic_forward(x3, w3, b3, gamma3, beta3, max_tk=128))
    ref3 = basic_reference(x3, w3, b3, gamma3, beta3)
    np.testing.assert_allclose(np.asarray(out3), np.asarray(ref3), rtol=1e-3, atol=1e-3)

    print("KERNEL_OK")
</pallas_src>

<mosaic_0001>
module attributes {stable_mosaic.version = 11 : i64} {
  func.func @_kernel_single_k(%arg0: i32, %arg1: memref<16x32xf32, #tpu.memory_space<vmem>>, %arg2: memref<32x128xf32, #tpu.memory_space<vmem>>, %arg3: memref<3x128xf32, #tpu.memory_space<vmem>>, %arg4: memref<16x128xf32, #tpu.memory_space<vmem>>) attributes {dimension_semantics = [#tpu.dimension_semantics<parallel>], iteration_bounds = array<i64: 1>, scalar_prefetch = 0 : i64, scratch_operands = 0 : i64, tpu.core_type = #tpu.core_type<tc>, window_params = [{transform_indices = @transform_0, window_bounds = array<i64: 16, 32>}, {pipeline_mode = #tpu.pipeline_mode<synchronous>, transform_indices = @transform_1, window_bounds = array<i64: 32, 128>}, {pipeline_mode = #tpu.pipeline_mode<synchronous>, transform_indices = @transform_2, window_bounds = array<i64: 3, 128>}, {transform_indices = @transform_3, window_bounds = array<i64: 16, 128>}]} {
    %c0 = arith.constant 0 : index
    %c0_0 = arith.constant 0 : index
    %0 = vector.load %arg1[%c0, %c0_0] : memref<16x32xf32, #tpu.memory_space<vmem>>, vector<16x32xf32>
    %c0_1 = arith.constant 0 : index
    %c0_2 = arith.constant 0 : index
    %1 = vector.load %arg2[%c0_1, %c0_2] : memref<32x128xf32, #tpu.memory_space<vmem>>, vector<32x128xf32>
    %cst = arith.constant dense<0.000000e+00> : vector<16x128xf32>
    %2 = tpu.matmul %0, %1, %cst {dimension_numbers = #tpu.dot_dimension_numbers<[1], [0], [0], [1], [0, 0, 1, 1], [], []>} : vector<16x32xf32>, vector<32x128xf32>, vector<16x128xf32> -> vector<16x128xf32>
    %c0_3 = arith.constant 0 : index
    %c0_4 = arith.constant 0 : index
    %3 = vector.load %arg3[%c0_3, %c0_4] : memref<3x128xf32, #tpu.memory_space<vmem>>, vector<3x128xf32>
    %4 = vector.extract_strided_slice %3 {offsets = [0, 0], sizes = [1, 128], strides = [1, 1]} : vector<3x128xf32> to vector<1x128xf32>
    %5 = vector.extract_strided_slice %3 {offsets = [1, 0], sizes = [1, 128], strides = [1, 1]} : vector<3x128xf32> to vector<1x128xf32>
    %6 = vector.extract_strided_slice %3 {offsets = [2, 0], sizes = [1, 128], strides = [1, 1]} : vector<3x128xf32> to vector<1x128xf32>
    %7 = vector.broadcast %4 : vector<1x128xf32> to vector<16x128xf32>
    %8 = arith.addf %2, %7 : vector<16x128xf32>
    %9 = tpu.iota {dimensions = array<i32: 1>} : vector<1x128xi32>
    %c64_i32 = arith.constant 64 : i32
    %10 = vector.broadcast %c64_i32 : i32 to vector<1x128xi32>
    %11 = arith.cmpi slt, %9, %10 : vector<1x128xi32>
    %cst_5 = arith.constant 0.000000e+00 : f32
    %12 = vector.shape_cast %11 : vector<1x128xi1> to vector<1x128xi1>
    %13 = vector.broadcast %12 : vector<1x128xi1> to vector<16x128xi1>
    %14 = vector.broadcast %cst_5 : f32 to vector<16x128xf32>
    %15 = arith.select %13, %8, %14 : vector<16x128xi1>, vector<16x128xf32>
    %cst_6 = arith.constant dense<0.000000e+00> : vector<16xf32>
    %16 = vector.multi_reduction <add>, %15, %cst_6 [1] : vector<16x128xf32> to vector<16xf32>
    %17 = vector.shape_cast %16 : vector<16xf32> to vector<16x1xf32>
    %cst_7 = arith.constant 1.562500e-02 : f32
    %18 = vector.broadcast %cst_7 : f32 to vector<16x1xf32>
    %19 = arith.mulf %17, %18 : vector<16x1xf32>
    %20 = vector.broadcast %19 : vector<16x1xf32> to vector<16x128xf32>
    %21 = arith.subf %8, %20 : vector<16x128xf32>
    %cst_8 = arith.constant 0.000000e+00 : f32
    %22 = vector.shape_cast %11 : vector<1x128xi1> to vector<1x128xi1>
    %23 = vector.broadcast %22 : vector<1x128xi1> to vector<16x128xi1>
    %24 = vector.broadcast %cst_8 : f32 to vector<16x128xf32>
    %25 = arith.select %23, %21, %24 : vector<16x128xi1>, vector<16x128xf32>
    %26 = arith.mulf %25, %25 : vector<16x128xf32>
    %cst_9 = arith.constant dense<0.000000e+00> : vector<16xf32>
    %27 = vector.multi_reduction <add>, %26, %cst_9 [1] : vector<16x128xf32> to vector<16xf32>
    %28 = vector.shape_cast %27 : vector<16xf32> to vector<16x1xf32>
    %cst_10 = arith.constant 1.562500e-02 : f32
    %29 = vector.broadcast %cst_10 : f32 to vector<16x1xf32>
    %30 = arith.mulf %28, %29 : vector<16x1xf32>
    %cst_11 = arith.constant 9.99999974E-6 : f32
    %31 = vector.broadcast %cst_11 : f32 to vector<16x1xf32>
    %32 = arith.addf %30, %31 : vector<16x1xf32>
    %33 = math.rsqrt %32 : vector<16x1xf32>
    %34 = vector.broadcast %33 : vector<16x1xf32> to vector<16x128xf32>
    %35 = arith.mulf %25, %34 : vector<16x128xf32>
    %36 = vector.broadcast %5 : vector<1x128xf32> to vector<16x128xf32>
    %37 = arith.mulf %35, %36 : vector<16x128xf32>
    %38 = vector.broadcast %6 : vector<1x128xf32> to vector<16x128xf32>
    %39 = arith.addf %37, %38 : vector<16x128xf32>
    %cst_12 = arith.constant 0.000000e+00 : f32
    %40 = vector.broadcast %cst_12 : f32 to vector<16x128xf32>
    %41 = arith.maximumf %39, %40 : vector<16x128xf32>
    %c0_13 = arith.constant 0 : index
    %c0_14 = arith.constant 0 : index
    %42 = vector.load %arg4[%c0_13, %c0_14] : memref<16x128xf32, #tpu.memory_space<vmem>>, vector<16x128xf32>
    tpu.vector_store %arg4[%c0_13, %c0_14], %41 {strides = array<i32>} : memref<16x128xf32, #tpu.memory_space<vmem>>, vector<16x128xf32>,
    return
  }
  func.func @transform_0(%arg0: i32) -> (i32, i32) {
    %c0_i32 = arith.constant 0 : i32
    %c0_i32_0 = arith.constant 0 : i32
    return %arg0, %c0_i32 : i32, i32
  }
  func.func @transform_1(%arg0: i32) -> (i32, i32) {
    %c0_i32 = arith.constant 0 : i32
    %c0_i32_0 = arith.constant 0 : i32
    %c0_i32_1 = arith.constant 0 : i32
    return %c0_i32, %c0_i32_0 : i32, i32
  }
  func.func @transform_2(%arg0: i32) -> (i32, i32) {
    %c0_i32 = arith.constant 0 : i32
    %c0_i32_0 = arith.constant 0 : i32
    %c0_i32_1 = arith.constant 0 : i32
    return %c0_i32, %c0_i32_0 : i32, i32
  }
  func.func @transform_3(%arg0: i32) -> (i32, i32) {
    %c0_i32 = arith.constant 0 : i32
    %c0_i32_0 = arith.constant 0 : i32
    return %arg0, %c0_i32 : i32, i32
  }
}

</mosaic_0001>

<bundles_post_ra>
// kernel: tpu_custom_call.1
= control target key start
LH: loop header
LB: loop body
LE: loop exit
PB: predicated region body
PF: predicated region fallthrough
CT: control target
= control target key end

     0   :  { %8 = vsyncpa [#allocation3], 0  ;;  %s386_s0 = inlined_call_operand.hbm [shape: f32[16,32], index: 0, kind: input, shape index: {}]   ;;  %s387_s1 = inlined_call_operand.hbm [shape: f32[32,128], index: 1, kind: input, shape index: {}]   ;;  %s388_s2 = inlined_call_operand.vmem [shape: f32[3,128], index: 2, kind: input, shape index: {}]   ;;  %s389_s3 = inlined_call_operand.hbm [shape: f32[16,128], index: 3, kind: output, shape index: {}]  }
   0x1   :  { %9 = vsyncpa [#allocation6], 0 }
   0x2   :  { %10 = vsyncpa [#allocation4], 0  ;;  %s309_s12 = smov [#allocation2]   ;;  %s237_s16 = scalar_lea.hbm %s386_s0, 256 }
   0x3   :  { %s16_s13 = sshll.u32 %s309_s12, 4  ;;  %p238_p0 = scmp.ne.s32.totalorder %s386_s0, %s237_s16  ;;  %s17_s13 = int_to_ptr.vmem [resolvable:$true] %s16_s13 }
   0x4   :  { %p241_p1 = scmp.lt.u32.totalorder %s237_s16, %s386_s0 }
   0x6   :  { %p243_p2 = pnand %p241_p1, %p238_p0 }
   0x8   :  { %246 = shalt.err (!%p243_p2)
}
   0x9   :  { %s247_s21 = scalar_lea.vmem %s17_s13, 256  ;;  %p252_p4 = scmp.lt.s32.totalorder %s17_s13, %s17_s13 }
   0xa   :  { %p248_p3 = scmp.ne.s32.totalorder %s17_s13, %s247_s21  ;;  %p253_p5 = scmp.lt.s32.totalorder %s247_s21, %s247_s21 }
   0xc   :  { %p254_p6 = por %p253_p5, %p252_p4 }
   0xe   :  { %p255_p7 = pnand %p254_p6, %p248_p3 }
  0x10   :  { %258 = shalt.err (!%p255_p7)
}
  0x11   :  { %s310_s22 = smov 128   ;;  %s311_s23 = smov 8  }
  0x12   :  { %22 = dma.hbm_to_vmem [thread:$0]  %s386_s0, 256, %s17_s13, [#allocation3], %s310_s22, %s310_s22, %s311_s23  }
  0x13   :  { %s312_s26 = smov [#allocation5]   ;;  %s259_s30 = scalar_lea.hbm %s387_s1, 512 }
  0x14   :  { %s28_s27 = sshll.u32 %s312_s26, 4  ;;  %p260_p8 = scmp.ne.s32.totalorder %s387_s1, %s259_s30  ;;  %s29_s27 = int_to_ptr.vmem [resolvable:$true] %s28_s27 }
  0x15   :  { %p263_p9 = scmp.lt.u32.totalorder %s259_s30, %s387_s1 }
  0x17   :  { %p265_p10 = pnand %p263_p9, %p260_p8 }
  0x19   :  { %268 = shalt.err (!%p265_p10)
}
  0x1a   :  { %s269_s8 = scalar_lea.vmem %s29_s27, 512  ;;  %p274_p12 = scmp.lt.s32.totalorder %s29_s27, %s29_s27 }
  0x1b   :  { %p270_p11 = scmp.ne.s32.totalorder %s29_s27, %s269_s8  ;;  %p275_p13 = scmp.lt.s32.totalorder %s269_s8, %s269_s8 }
  0x1d   :  { %p276_p0 = por %p275_p13, %p274_p12 }
  0x1f   :  { %p277_p1 = pnand %p276_p0, %p270_p11 }
  0x21   :  { %280 = shalt.err (!%p277_p1)
}
  0x22   :  { %34 = dma.hbm_to_vmem [thread:$0]  %s387_s1, 512, %s29_s27, [#allocation6], %s310_s22, %s310_s22, %s311_s23  }
  0x23   :  { %303 = dma.done.wait [#allocation3], 256  }
  0x24   :  { %304 = vsyncadd [#allocation3], 4294967040 }
  0x25   :  { %305 = dma.done.wait [#allocation6], 512  }
  0x26   :  { %306 = vsyncadd [#allocation6], 4294966784  ;;  %vm54_vm0 = vcmask 261120   ;;  %v45_v0 = vld [vmem:[#allocation5] sm:$0xff]  ;;  %v46_v1 = vld [vmem:[#allocation5 + $0x8] sm:$0xff]  ;;  %v50_v8 = vlaneseq }
  0x27   :  { %v47_v2 = vld [vmem:[#allocation5 + $0x10] sm:$0xff]  ;;  %v220_v3 = vpack.c.bf16 %v46_v1, %v45_v0  ;;  %v48_v4 = vld [vmem:[#allocation5 + $0x18] sm:$0xff] }
  0x28   :  { %v43_v5 = vld [vmem:[#allocation2] sm:$0xff]  ;;  %v224_v6 = vpack.c.bf16 %v48_v4, %v47_v2  ;;  %v44_v7 = vld [vmem:[#allocation2 + $0x8] sm:$0xff]  ;;  %v51_v9 = vshrl.u32 %v50_v8, 7  ;;  %v137_v12 = vand.u32 127, %v50_v8 }
  0x29   :  { %217 = vmatprep.mubr.msk.f32.mxu0 %vm54_vm0, %v43_v5  ;;  %221 = vmatprep.subr.bf16.mxu0 %v220_v3  ;;  %v49_v11 = vld [vmem:[%s388_s2] sm:$0x7]  ;;  %s313_s2 = smov [#allocation7]  }
  0x2a   :  { %223 = vmatpush3.bf16.msra.mxu0 %v220_v3  ;;  %v52_v10 = vsub.s32 0, %v51_v9  ;;  %vm138_vm1 = vcmp.lt.s32.totalorder %v137_v12, 64  ;;  %v169_v36 = vsub.s32 1, %v51_v9  ;;  %v175_v37 = vsub.s32 2, %v51_v9  ;;  %s188_s11 = sshll.u32 %s313_s2, 4  ;;  %s189_s11 = int_to_ptr.vmem [resolvable:$true] %s188_s11 }
  0x2b   :  { %225 = vmatprep.subr.bf16.mxu0 %v224_v6  ;;  %s281_s12 = scalar_lea.vmem %s189_s11, 256  ;;  %p286_p3 = scmp.lt.s32.totalorder %s189_s11, %s189_s11 }
  0x2c   :  { %v53_v13 = vrot.slane %v49_v11, %v52_v10  ;;  %v170_v38 = vrot.slane %v49_v11, %v169_v36  ;;  %v176_v40 = vrot.slane %v49_v11, %v175_v37  ;;  %p282_p2 = scmp.ne.s32.totalorder %s189_s11, %s281_s12  ;;  %p287_p4 = scmp.lt.s32.totalorder %s281_s12, %s281_s12 }
  0x2e   :  { %227 = vmatpush3.bf16.msra.mxu0 %v224_v6  ;;  %p288_p5 = por %p287_p4, %p286_p3 }
  0x30   :  { %p289_p6 = pnand %p288_p5, %p282_p2 }
  0x31   :  { %218 = vmatmul.mubr.msk.f32.vlgmr.msra.gmra.mrb[0].mxu0 %vm54_vm0, %v44_v7 }
 0x104   :  { %v219_v14 = vpop.f32.mrb[0].mxu0 }
 0x105   :  { %v127_v15 = vpop.f32.mrb[1].mxu0  ;;  %v133_v17 = vadd.f32 %v219_v14, %v53_v13 }
 0x106   :  { %v128_v16 = vadd.f32 %v127_v15, %v53_v13 }
 0x107   :  { %v142_v19 = vsel %vm138_vm1, %v133_v17, 0.0 }
 0x108   :  { %v141_v18 = vsel %vm138_vm1, %v128_v16, 0.0 }
 0x109   :  { %143 = vadd.xlane.f32.xlu0 %v141_v18 }
 0x10d   :  { %145 = vadd.xlane.f32.xlu0 %v142_v19 }
 0x196   :  { %v144_v20 = vpop.xlane.xlu0 %143 }
 0x197   :  { %v147_v21 = vmul.f32 0.015625, %v144_v20 }
 0x199   :  { %v149_v22 = vsub.f32 %v128_v16, %v147_v21 }
 0x19a   :  { %v146_v23 = vpop.xlane.xlu0 %145 }
 0x19b   :  { %v148_v24 = vmul.f32 0.015625, %v146_v23  ;;  %v151_v25 = vsel %vm138_vm1, %v149_v22, 0.0 }
 0x19c   :  { %v153_v26 = vmul.f32 %v151_v25, %v151_v25 }
 0x19d   :  { %v150_v27 = vsub.f32 %v133_v17, %v148_v24 }
 0x19e   :  { %155 = vadd.xlane.f32.xlu1 %v153_v26 }
 0x19f   :  { %v152_v28 = vsel %vm138_vm1, %v150_v27, 0.0 }
 0x1a0   :  { %v154_v29 = vmul.f32 %v152_v28, %v152_v28 }
 0x1a2   :  { %157 = vadd.xlane.f32.xlu1 %v154_v29 }
 0x22b   :  { %v156_v30 = vpop.xlane.xlu1 %155 }
 0x22c   :  { %v159_v31 = vmul.f32 0.015625, %v156_v30 }
 0x22e   :  { %v161_v32 = vadd.f32 1e-05, %v159_v31 }
 0x22f   :  { %v158_v33 = vpop.xlane.xlu1 %157 }
 0x230   :  { %233 = vrsqrt.f32 %v161_v32  ;;  %v160_v34 = vmul.f32 0.015625, %v158_v33 }
 0x232   :  { %v162_v35 = vadd.f32 1e-05, %v160_v34 }
 0x234   :  { %235 = vrsqrt.f32 %v162_v35 }
 0x23a   :  { %v234_v39 = vpop.eup %233 }
 0x23b   :  { %v165_v41 = vmul.f32 %v234_v39, %v151_v25 }
 0x23d   :  { %v171_v42 = vmul.f32 %v170_v38, %v165_v41 }
 0x23e   :  { %v236_v43 = vpop.eup %235 }
 0x23f   :  { %v166_v44 = vmul.f32 %v236_v43, %v152_v28  ;;  %v177_v45 = vadd.f32 %v176_v40, %v171_v42 }
 0x241   :  { %v172_v46 = vmul.f32 %v170_v38, %v166_v44  ;;  %v179_v47 = vmax.f32 %v177_v45, 0.0 }
 0x243   :  { %v178_v48 = vadd.f32 %v176_v40, %v172_v46  ;;  %181 = vst [vmem:[#allocation7] sm:$0xff] %v179_v47 }
 0x245   :  { %v180_v49 = vmax.f32 %v178_v48, 0.0 }
 0x247   :  { %182 = vst [vmem:[#allocation7 + $0x8] sm:$0xff] %v180_v49 }
 0x248   :  { %292 = shalt.err (!%p289_p6)
}
 0x249   :  { %s293_s15 = scalar_lea.hbm %s389_s3, 256 }
 0x24a   :  { %p294_p7 = scmp.ne.s32.totalorder %s389_s3, %s293_s15  ;;  %p297_p8 = scmp.lt.u32.totalorder %s293_s15, %s389_s3 }
 0x24c   :  { %p299_p9 = pnand %p297_p8, %p294_p7 }
 0x24e   :  { %302 = shalt.err (!%p299_p9)
}
 0x24f   :  { %194 = dma.vmem_to_hbm [thread:$0]  %s189_s11, 256, %s389_s3, [#allocation4], %s310_s22, %s310_s22, %s311_s23  }
 0x250   :  { %307 = dma.done.wait [#allocation4], 256  }
 0x251   :  { %308 = vsyncadd [#allocation4], 4294967040 }
 0x252   :  { %198 = vsyncpa [#allocation3], 1 }
 0x253   :  { %199 = vsyncpa [#allocation6], 1 }
 0x254   :  { %200 = vsyncpa [#allocation4], 1 }

</bundles_post_ra>
